<compile_context>
chip_gen: v5e
topology: v5e:2x2
jax: 0.10.0
libtpu: 0.0.40
codegen_flags: <defaults>
</compile_context>

<pallas_src>
import functools
import math

import jax
import jax.numpy as jnp
from jax.experimental import pallas as pl
from jax.experimental.pallas import tpu as pltpu


# ---------------------------------------------------------------------------
# Counter-based Bernoulli mask (pure int32 jnp ops -> lowers on Mosaic & interpret)
# ---------------------------------------------------------------------------
def _c32(c):
    """Python int constant -> int32 with two's-complement wrap."""
    c &= 0xFFFFFFFF
    if c >= (1 << 31):
        c -= 1 << 32
    return jnp.int32(c)


def _srl32(v, n):
    """Logical right shift for int32 (arithmetic shift + mask)."""
    return (v >> n) & jnp.int32((1 << (32 - n)) - 1)


def _hash32(v):
    """lowbias32-style integer mixer (int32 arithmetic wraps)."""
    v = v ^ _srl32(v, 16)
    v = v * _c32(0x7FEB352D)
    v = v ^ _srl32(v, 15)
    v = v * _c32(0x846CA68B)
    v = v ^ _srl32(v, 16)
    return v


def _keep_mask(flat_idx, seed, thresh24):
    """Bernoulli(keep_prob) mask: keep iff low 24 hash bits < thresh24."""
    v = flat_idx * _c32(0x9E3779B1) + seed * _c32(0x85EBCA77)
    h = _hash32(v)
    return (h & jnp.int32(0x00FFFFFF)) < jnp.int32(thresh24)


def _keep_threshold(rate):
    p = 1.0 - float(rate)
    t = int(round(p * (1 << 24)))
    return max(0, min(1 << 24, t))


# ---------------------------------------------------------------------------
# Layout helpers
# ---------------------------------------------------------------------------
def _as_2d(x):
    """Flatten to (rows, cols) with a lane-dense (multiple-of-128) last dim if possible."""
    total = x.size
    if x.ndim >= 2 and x.shape[-1] % 128 == 0:
        return x.reshape(-1, x.shape[-1])
    for c in (2048, 1024, 512, 256, 128):
        if total % c == 0:
            return x.reshape(-1, c)
    if x.ndim >= 2:
        return x.reshape(-1, x.shape[-1])
    return x.reshape(1, total)


def _tile_rows(nrows, ncols, itemsize, target_bytes=2 * 1024 * 1024):
    """Largest multiple-of-8 row tile with ~target_bytes per buffer (or full dim)."""
    if nrows <= 8:
        return int(nrows)
    rows = target_bytes // max(1, ncols * itemsize)
    rows = max(8, min(nrows, (rows // 8) * 8))
    return int(rows)


# ---------------------------------------------------------------------------
# Kernel: elementwise resample path (fresh Bernoulli mask at full x shape)
# ---------------------------------------------------------------------------
def _resample_kernel(ncols, tile_rows, thresh24, seed_ref, x_ref, o_ref):
    i = pl.program_id(0)
    shp = x_ref.shape
    row = jax.lax.broadcasted_iota(jnp.int32, shp, 0) + i * tile_rows
    col = jax.lax.broadcasted_iota(jnp.int32, shp, 1)
    flat = row * jnp.int32(ncols) + col          # global element index (tile-invariant)
    keep = _keep_mask(flat, seed_ref[0], thresh24)
    o_ref[...] = jnp.where(keep, x_ref[...], jnp.zeros_like(x_ref[...]))


def bdropout_resample(x, rate, seed):
    x2 = _as_2d(x)
    nrows, ncols = x2.shape
    tr = _tile_rows(nrows, ncols, x2.dtype.itemsize)
    thresh24 = _keep_threshold(rate)
    kernel = functools.partial(_resample_kernel, ncols, tr, thresh24)
    out = pl.pallas_call(
        kernel,
        out_shape=jax.ShapeDtypeStruct(x2.shape, x2.dtype),
        grid_spec=pltpu.PrefetchScalarGridSpec(
            num_scalar_prefetch=1,
            grid=(pl.cdiv(nrows, tr),),
            in_specs=[pl.BlockSpec((tr, ncols), lambda i, seed: (i, 0))],
            out_specs=pl.BlockSpec((tr, ncols), lambda i, seed: (i, 0)),
        ),
        compiler_params=pltpu.CompilerParams(dimension_semantics=("parallel",)),
    )(jnp.array([seed], dtype=jnp.int32), x2)
    return out.reshape(x.shape)


# ---------------------------------------------------------------------------
# Kernel: shared-noise path (noise over x.shape[-mask_dims:], broadcast over batch)
# ---------------------------------------------------------------------------
def _shared_noise_kernel(ncols, thresh24, seed_ref, x_ref, o_ref, noise_ref):
    # Noise depends only on the position inside the (S, D) sample block (column of
    # the flattened layout) + seed, so every batch tile regenerates the identical
    # mask — this keeps the kernel tileable over the leading (batch) dims.
    col = jax.lax.broadcasted_iota(jnp.int32, (1, ncols), 1)
    keep = _keep_mask(col, seed_ref[0], thresh24)
    noise = keep.astype(x_ref.dtype)                 # (1, ncols) of 0/1
    o_ref[...] = x_ref[...] * noise                  # broadcast over tile rows

    @pl.when(pl.program_id(0) == 0)
    def _():
        noise_ref[...] = noise                       # resident block; write once


def bdropout_shared_noise(x, rate, seed, mask_dims=2):
    sample_shape = x.shape[-mask_dims:]
    m = int(math.prod(sample_shape))
    lead = x.size // m
    x2 = x.reshape(lead, m)
    tr = _tile_rows(lead, m, x2.dtype.itemsize)
    thresh24 = _keep_threshold(rate)
    kernel = functools.partial(_shared_noise_kernel, m, thresh24)
    out, noise = pl.pallas_call(
        kernel,
        out_shape=(
            jax.ShapeDtypeStruct((lead, m), x.dtype),
            jax.ShapeDtypeStruct((1, m), x.dtype),
        ),
        grid_spec=pltpu.PrefetchScalarGridSpec(
            num_scalar_prefetch=1,
            grid=(pl.cdiv(lead, tr),),
            in_specs=[pl.BlockSpec((tr, m), lambda i, seed: (i, 0))],
            out_specs=[
                pl.BlockSpec((tr, m), lambda i, seed: (i, 0)),
                pl.BlockSpec((1, m), lambda i, seed: (0, 0)),   # resident noise block
            ],
        ),
        # noise output block is revisited across the grid -> keep this axis arbitrary
        compiler_params=pltpu.CompilerParams(dimension_semantics=("arbitrary",)),
    )(jnp.array([seed], dtype=jnp.int32), x2)
    return out.reshape(x.shape), noise.reshape(sample_shape)


# ---------------------------------------------------------------------------
# Module-like wrapper (buffer/state plumbing stays in plain Python/JAX)
# ---------------------------------------------------------------------------
class BDropoutPallas:
    def __init__(self, rate=0.5, name=None, regularizer_scale=1.0, seed=0):
        self.name = name
        self.rate = float(rate)
        self.p = 1.0 - self.rate
        self.regularizer_scale = jnp.float32(0.5 * regularizer_scale ** 2)
        # torch init: noise = bernoulli(1 - rate), a 0-dim tensor. Deterministic stand-in.
        self.noise = jnp.ones((), dtype=jnp.float32)
        self._seed = int(seed)

    def _next_seed(self):
        self._seed += 1
        return self._seed

    def weights_regularizer(self, weights):
        self.p = 1.0 - self.rate
        return self.regularizer_scale * (self.p * weights ** 2).sum()

    def biases_regularizer(self, biases):
        return self.regularizer_scale * (biases ** 2).sum()

    def forward(self, x, resample=True, mask_dims=2):
        sample_shape = x.shape[-mask_dims:]
        if sample_shape != self.noise.shape:
            # regenerate stored noise at sample_shape; broadcast multiply in-kernel
            out, noise = bdropout_shared_noise(
                x, self.rate, self._next_seed(), mask_dims=mask_dims)
            self.noise = noise
            return out
        elif resample:
            # fresh elementwise Bernoulli(p) mask at the full x shape, in-kernel
            return bdropout_resample(x, self.rate, self._next_seed())
        # stored-noise multiply: trivial broadcast mul, leave to XLA (no Pallas launch)
        return x * self.noise

    __call__ = forward


if __name__ == "__main__":
    key = jax.random.PRNGKey(0)
    B, S, D = 2, 8, 32
    x = jax.random.normal(key, (B, S, D), dtype=jnp.float32)

    layer = BDropoutPallas(rate=0.5, regularizer_scale=1.0, seed=0)

    # 1st call: noise shape mismatch -> shared-noise (broadcast) branch
    out1 = jax.block_until_ready(layer(x))
    assert out1.shape == x.shape and out1.dtype == x.dtype
    assert layer.noise.shape == (S, D)
    assert jnp.allclose(out1, x * layer.noise[None, :, :])

    # 2nd call: matching noise shape + resample=True -> elementwise-resample branch
    out2 = jax.block_until_ready(layer(x, resample=True))
    assert out2.shape == x.shape and out2.dtype == x.dtype
    # every output element is either 0 (dropped) or exactly x (kept, no rescale)
    kept_or_dropped = jnp.logical_or(out2 == 0.0, out2 == x)
    assert bool(jnp.all(kept_or_dropped))

    # 3rd call: resample=False with matching noise -> stored-noise multiply (plain JAX)
    out3 = jax.block_until_ready(layer(x, resample=False))
    assert jnp.allclose(out3, x * layer.noise[None, :, :])

    print("KERNEL_OK")
</pallas_src>

<mosaic_0001>
module attributes {stable_mosaic.version = 11 : i64} {
  func.func @_shared_noise_kernel(%arg0: i32, %arg1: memref<1xi32, #tpu.memory_space<smem>>, %arg2: memref<2x256xf32, #tpu.memory_space<vmem>>, %arg3: memref<2x256xf32, #tpu.memory_space<vmem>>, %arg4: memref<1x256xf32, #tpu.memory_space<vmem>>) attributes {dimension_semantics = [#tpu.dimension_semantics<arbitrary>], iteration_bounds = array<i64: 1>, scalar_prefetch = 1 : i64, scratch_operands = 0 : i64, tpu.core_type = #tpu.core_type<tc>, window_params = [{transform_indices = @transform_0, window_bounds = array<i64: 2, 256>}, {transform_indices = @transform_1, window_bounds = array<i64: 2, 256>}, {pipeline_mode = #tpu.pipeline_mode<synchronous>, transform_indices = @transform_2, window_bounds = array<i64: 1, 256>}]} {
    %0 = tpu.iota {dimensions = array<i32: 1>} : vector<1x256xi32>
    %c0 = arith.constant 0 : index
    %1 = memref.load %arg1[%c0] : memref<1xi32, #tpu.memory_space<smem>>
    %c-1640531535_i32 = arith.constant -1640531535 : i32
    %2 = vector.broadcast %c-1640531535_i32 : i32 to vector<1x256xi32>
    %3 = arith.muli %0, %2 : vector<1x256xi32>
    %c-2048144777_i32 = arith.constant -2048144777 : i32
    %4 = arith.muli %1, %c-2048144777_i32 : i32
    %5 = vector.broadcast %4 : i32 to vector<1x256xi32>
    %6 = arith.addi %3, %5 : vector<1x256xi32>
    %c16_i32 = arith.constant 16 : i32
    %7 = vector.broadcast %c16_i32 : i32 to vector<1x256xi32>
    %8 = arith.shrsi %6, %7 : vector<1x256xi32>
    %c65535_i32 = arith.constant 65535 : i32
    %9 = vector.broadcast %c65535_i32 : i32 to vector<1x256xi32>
    %10 = arith.andi %8, %9 : vector<1x256xi32>
    %11 = arith.xori %6, %10 : vector<1x256xi32>
    %c2146121005_i32 = arith.constant 2146121005 : i32
    %12 = vector.broadcast %c2146121005_i32 : i32 to vector<1x256xi32>
    %13 = arith.muli %11, %12 : vector<1x256xi32>
    %c15_i32 = arith.constant 15 : i32
    %14 = vector.broadcast %c15_i32 : i32 to vector<1x256xi32>
    %15 = arith.shrsi %13, %14 : vector<1x256xi32>
    %c131071_i32 = arith.constant 131071 : i32
    %16 = vector.broadcast %c131071_i32 : i32 to vector<1x256xi32>
    %17 = arith.andi %15, %16 : vector<1x256xi32>
    %18 = arith.xori %13, %17 : vector<1x256xi32>
    %c-2073254261_i32 = arith.constant -2073254261 : i32
    %19 = vector.broadcast %c-2073254261_i32 : i32 to vector<1x256xi32>
    %20 = arith.muli %18, %19 : vector<1x256xi32>
    %c16_i32_0 = arith.constant 16 : i32
    %21 = vector.broadcast %c16_i32_0 : i32 to vector<1x256xi32>
    %22 = arith.shrsi %20, %21 : vector<1x256xi32>
    %c65535_i32_1 = arith.constant 65535 : i32
    %23 = vector.broadcast %c65535_i32_1 : i32 to vector<1x256xi32>
    %24 = arith.andi %22, %23 : vector<1x256xi32>
    %25 = arith.xori %20, %24 : vector<1x256xi32>
    %c16777215_i32 = arith.constant 16777215 : i32
    %26 = vector.broadcast %c16777215_i32 : i32 to vector<1x256xi32>
    %27 = arith.andi %25, %26 : vector<1x256xi32>
    %c8388608_i32 = arith.constant 8388608 : i32
    %28 = vector.broadcast %c8388608_i32 : i32 to vector<1x256xi32>
    %29 = arith.cmpi slt, %27, %28 : vector<1x256xi32>
    %30 = arith.extui %29 : vector<1x256xi1> to vector<1x256xi32>
    %31 = arith.sitofp %30 : vector<1x256xi32> to vector<1x256xf32>
    %c0_2 = arith.constant 0 : index
    %c0_3 = arith.constant 0 : index
    %32 = vector.load %arg2[%c0_2, %c0_3] : memref<2x256xf32, #tpu.memory_space<vmem>>, vector<2x256xf32>
    %33 = vector.broadcast %31 : vector<1x256xf32> to vector<2x256xf32>
    %34 = arith.mulf %32, %33 : vector<2x256xf32>
    %c0_4 = arith.constant 0 : index
    %c0_5 = arith.constant 0 : index
    %35 = vector.load %arg3[%c0_4, %c0_5] : memref<2x256xf32, #tpu.memory_space<vmem>>, vector<2x256xf32>
    tpu.vector_store %arg3[%c0_4, %c0_5], %34 {strides = array<i32>} : memref<2x256xf32, #tpu.memory_space<vmem>>, vector<2x256xf32>,
    %c0_i32 = arith.constant 0 : i32
    %36 = arith.cmpi eq, %arg0, %c0_i32 : i32
    %37 = arith.extui %36 : i1 to i32
    %c0_i32_6 = arith.constant 0 : i32
    %38 = arith.cmpi ne, %37, %c0_i32_6 : i32
    scf.if %38 {
      %c0_7 = arith.constant 0 : index
      %c0_8 = arith.constant 0 : index
      %39 = vector.load %arg4[%c0_7, %c0_8] : memref<1x256xf32, #tpu.memory_space<vmem>>, vector<1x256xf32>
      tpu.vector_store %arg4[%c0_7, %c0_8], %31 {strides = array<i32>} : memref<1x256xf32, #tpu.memory_space<vmem>>, vector<1x256xf32>,
    } else {
    }
    return
  }
  func.func @transform_0(%arg0: i32, %arg1: memref<1xi32, #tpu.memory_space<smem>>) -> (i32, i32) {
    %c0_i32 = arith.constant 0 : i32
    %c0_i32_0 = arith.constant 0 : i32
    return %arg0, %c0_i32 : i32, i32
  }
  func.func @transform_1(%arg0: i32, %arg1: memref<1xi32, #tpu.memory_space<smem>>) -> (i32, i32) {
    %c0_i32 = arith.constant 0 : i32
    %c0_i32_0 = arith.constant 0 : i32
    return %arg0, %c0_i32 : i32, i32
  }
  func.func @transform_2(%arg0: i32, %arg1: memref<1xi32, #tpu.memory_space<smem>>) -> (i32, i32) {
    %c0_i32 = arith.constant 0 : i32
    %c0_i32_0 = arith.constant 0 : i32
    %c0_i32_1 = arith.constant 0 : i32
    return %c0_i32, %c0_i32_0 : i32, i32
  }
}

</mosaic_0001>

<bundles_post_ra>
// kernel: tpu_custom_call.1
= control target key start
LH: loop header
LB: loop body
LE: loop exit
PB: predicated region body
PF: predicated region fallthrough
CT: control target
= control target key end

     0   :  { %10 = vsyncpa [#allocation5], 0  ;;  %s249_s0 = inlined_call_operand.<no memory space> [shape: s32[1], index: 0, kind: input, shape index: {}]   ;;  %s250_s1 = inlined_call_operand.hbm [shape: f32[2,256], index: 1, kind: input, shape index: {}]   ;;  %s251_s2 = inlined_call_operand.hbm [shape: f32[2,256], index: 2, kind: output, shape index: {0}]   ;;  %s252_s3 = inlined_call_operand.hbm [shape: f32[1,256], index: 3, kind: output, shape index: {1}]  }
   0x1   :  { %11 = vsyncpa [#allocation6], 0 }
   0x2   :  { %12 = vsyncpa [#allocation9], 0  ;;  %s18_s14 = sshll.u32 %s250_s1, 4  ;;  %s213_s15 = smov [#allocation4]   ;;  %s19_s14 = int_to_ptr.hbm [resolvable:$true] %s18_s14 }
   0x3   :  { %s20_s16 = sshll.u32 %s213_s15, 4  ;;  %s21_s16 = int_to_ptr.vmem [resolvable:$true] %s20_s16 }
   0x4   :  { %23 = dma.hbm_to_vmem [thread:$0]  %s19_s14, 64, %s21_s16, [#allocation5]  }
   0x5   :  { %207 = dma.done.wait [#allocation5], 64  }
   0x6   :  { %208 = vsyncadd [#allocation5], 4294967232  ;;  %v28_v0 = vlaneseq  ;;  %s34_s19 = smul.u32 2246822519, %s249_s0  ;;  %s214_s0 = smov [#allocation8]   ;;  %v215_v26 = vmov 0.0  }
   0x7   :  { %s106_s1 = sshll.u32 %s214_s0, 4  ;;  %s108_s22 = sshll.u32 %s252_s3, 4  ;;  %vm72_vm2 = vcmask 1041408   ;;  %vm82_vm3 = vcmask 1040384   ;;  %v68_v29 = vld [vmem:[#allocation4] sm:$0xf]  ;;  %s107_s1 = int_to_ptr.vmem [resolvable:$true] %s106_s1  ;;  %s109_s22 = int_to_ptr.hbm [resolvable:$true] %s108_s22 }
   0x8   :  { %v29_v1 = vand.u32 127, %v28_v0  ;;  %v35_v4 = vstv %s34_s19  ;;  %s97_s25 = sshll.u32 %s251_s2, 4  ;;  %vm87_vm4 = vcmp.lt.s32.totalorder %v28_v0, 256  ;;  %s216_s26 = smov [#allocation7]   ;;  %s98_s25 = int_to_ptr.hbm [resolvable:$true] %s97_s25 }
   0x9   :  { %s95_s27 = sshll.u32 %s216_s26, 4  ;;  %s96_s27 = int_to_ptr.vmem [resolvable:$true] %s95_s27 }
   0xa   :  { %v30_v2 = vadd.s32 128, %v29_v1  ;;  %v32_v3 = vmul.u32 2654435761, %v29_v1 }
   0xc   :  { %v33_v5 = vmul.u32 2654435761, %v30_v2  ;;  %v36_v6 = vadd.s32 %v35_v4, %v32_v3 }
   0xe   :  { %v37_v7 = vadd.s32 %v35_v4, %v33_v5  ;;  %v123_v8 = vshrl.u32 %v36_v6, 16 }
  0x10   :  { %v124_v9 = vshrl.u32 %v37_v7, 16  ;;  %v42_v10 = vxor.u32 %v123_v8, %v36_v6 }
  0x12   :  { %v43_v11 = vxor.u32 %v124_v9, %v37_v7  ;;  %v44_v12 = vmul.u32 2146121005, %v42_v10 }
  0x14   :  { %v45_v13 = vmul.u32 2146121005, %v43_v11  ;;  %v125_v14 = vshrl.u32 %v44_v12, 15 }
  0x16   :  { %v126_v15 = vshrl.u32 %v45_v13, 15  ;;  %v50_v16 = vxor.u32 %v125_v14, %v44_v12 }
  0x18   :  { %v51_v17 = vxor.u32 %v126_v15, %v45_v13  ;;  %v52_v18 = vmul.u32 2221713035, %v50_v16 }
  0x1a   :  { %v53_v19 = vmul.u32 2221713035, %v51_v17  ;;  %v127_v20 = vshrl.u32 %v52_v18, 16 }
  0x1c   :  { %v128_v21 = vshrl.u32 %v53_v19, 16  ;;  %v58_v22 = vxor.u32 %v127_v20, %v52_v18 }
  0x1e   :  { %v59_v23 = vxor.u32 %v128_v21, %v53_v19  ;;  %v60_v24 = vand.u32 16777215, %v58_v22 }
  0x20   :  { %v61_v25 = vand.u32 16777215, %v59_v23  ;;  %vm62_vm0 = vcmp.lt.s32.totalorder %v60_v24, 8388608 }
  0x21   :  { %v129_v27 = vsel %vm62_vm0, 1.0, %v215_v26 }
  0x22   :  { %vm63_vm1 = vcmp.lt.s32.totalorder %v61_v25, 8388608 }
  0x23   :  { %v130_v28 = vsel %vm63_vm1, 1.0, %v215_v26 }
  0x24   :  { %v71_v30 = vrot.slane %v130_v28, 6  ;;  %v81_v31 = vrot.slane %v130_v28, 7 }
  0x26   :  { %v73_v32 = vsel %vm72_vm2, %v129_v27, %v71_v30  ;;  %v83_v33 = vsel %vm82_vm3, %v129_v27, %v81_v31 }
  0x27   :  { %v75_v34 = vmul.f32 %v73_v32, %v68_v29  ;;  %89 = vst.msk [vmem:[#allocation8] sm:$0x3] %vm87_vm4, %v83_v33 }
  0x28   :  { %111 = dma.vmem_to_hbm [thread:$0]  %s107_s1, 32, %s109_s22, [#allocation9]  }
  0x29   :  { %76 = vst [vmem:[#allocation7] sm:$0xf] %v75_v34 }
  0x2a   :  { %100 = dma.vmem_to_hbm [thread:$0]  %s96_s27, 64, %s98_s25, [#allocation6]  }
  0x2b   :  { %209 = dma.done.wait [#allocation6], 64  }
  0x2c   :  { %210 = vsyncadd [#allocation6], 4294967232 }
  0x2d   :  { %211 = dma.done.wait [#allocation9], 32  }
  0x2e   :  { %212 = vsyncadd [#allocation9], 4294967264 }
  0x2f   :  { %120 = vsyncpa [#allocation5], 1 }
  0x30   :  { %121 = vsyncpa [#allocation6], 1 }
  0x31   :  { %122 = vsyncpa [#allocation9], 1 }

</bundles_post_ra>
